<compile_context>
chip_gen: v5e
topology: v5e:2x2
jax: 0.10.0
libtpu: 0.0.40
codegen_flags: <defaults>
</compile_context>

<pallas_src>
import math
import random

import jax
import jax.numpy as jnp
import numpy as np
from jax import lax
from jax.experimental import pallas as pl
from jax.experimental.pallas import tpu as pltpu

_LANE = 512               # lane-dense last dim (multiple of 128)
_TARGET_TILE_ROWS = 512   # 512 x 512 f32 tile = 1 MiB; double-buffered in+out = 4 MiB


def _round_up(n, m):
    return ((n + m - 1) // m) * m


def _hash32(x):
    """lowbias32 integer hash (bijective on uint32); pure VPU ops."""
    x = x ^ (x >> 16)
    x = x * jnp.uint32(0x7FEB352D)
    x = x ^ (x >> 15)
    x = x * jnp.uint32(0x846CA68B)
    x = x ^ (x >> 16)
    return x


def _std_normal_from_uniform(u):
    """N(0,1) from U(0,1): z = sqrt(2) * erfinv(2u - 1).

    Giles' single-precision erfinv approximation: 1 log + 1 sqrt on the EUP,
    ~18 FMAs + 1 select on the VPU. Branchless (both branches computed)."""
    x = 2.0 * u - 1.0                       # in (-1, 1), never +/-1
    w = -jnp.log((1.0 - x) * (1.0 + x))     # = -log(1 - x^2)
    # central branch (w < 5)
    wc = w - 2.5
    pc = jnp.float32(2.81022636e-08)
    for c in (3.43273939e-07, -3.5233877e-06, -4.39150654e-06, 2.1858087e-04,
              -1.25372503e-03, -4.17768164e-03, 2.46640727e-01, 1.50140941e+00):
        pc = pc * wc + jnp.float32(c)
    # tail branch (w >= 5)
    wt = jnp.sqrt(w) - 3.0
    pt = jnp.float32(-2.00214257e-04)
    for c in (1.00950558e-04, 1.34934322e-03, -3.67342844e-03, 5.73950773e-03,
              -7.62246130e-03, 9.43887047e-03, 1.00167406e+00, 2.83297682e+00):
        pt = pt * wt + jnp.float32(c)
    p = jnp.where(w < 5.0, pc, pt)
    return jnp.float32(math.sqrt(2.0)) * (p * x)


def _jitter_kernel(seed_ref, scale_ref, x_ref, o_ref):
    """out = x + N(0,1) * scale[tile]; noise generated in-register per tile."""
    pid = pl.program_id(0)
    tile_r, lane = x_ref.shape
    # unique per-element counter over the whole slab -> distinct noise per tile
    row = lax.broadcasted_iota(jnp.int32, (tile_r, lane), 0)
    col = lax.broadcasted_iota(jnp.int32, (tile_r, lane), 1)
    gid = (pid * tile_r + row) * lane + col
    key = gid.astype(jnp.uint32) + seed_ref[0].astype(jnp.uint32) * jnp.uint32(0x9E3779B9)
    bits = _hash32(key)
    # top 24 bits -> uniform in (0, 1), exactly representable in f32
    u = ((bits >> 8).astype(jnp.int32).astype(jnp.float32) + 0.5) * jnp.float32(1.0 / 16777216.0)
    z = _std_normal_from_uniform(u)
    scale = scale_ref[pid]                  # std * apply_flag (0.0 => exact passthrough)
    o_ref[...] = (x_ref[...].astype(jnp.float32) + z * scale).astype(o_ref.dtype)


@jax.jit
def _jitter_tensors(tensors, scales_vec, seed_arr):
    """Fused jitter over a tuple of tensors.

    tensors:    tuple of arrays (any shapes, common float dtype)
    scales_vec: f32[num_tensors]  (std * apply_flag per tensor)
    seed_arr:   i32[1]
    Returns a tuple of arrays with the original shapes/dtypes."""
    io_dtype = jnp.result_type(*[t.dtype for t in tensors])

    sizes = [int(np.prod(t.shape)) for t in tensors]
    rows = [max(1, _round_up(sz, _LANE) // _LANE) for sz in sizes]
    tile_r = min(_TARGET_TILE_ROWS, _round_up(max(rows), 8))
    rows_pad = [_round_up(r, tile_r) for r in rows]

    # Build the lane-dense slab [R_total, 512]
    slabs = []
    for t, sz, rp in zip(tensors, sizes, rows_pad):
        flat = t.reshape(-1).astype(io_dtype)
        flat = jnp.pad(flat, (0, rp * _LANE - sz))
        slabs.append(flat.reshape(rp, _LANE))
    slab = jnp.concatenate(slabs, axis=0) if len(slabs) > 1 else slabs[0]

    r_total = slab.shape[0]
    num_tiles = r_total // tile_r
    tile_counts = [rp // tile_r for rp in rows_pad]
    owner = np.repeat(np.arange(len(tensors), dtype=np.int32), tile_counts)
    scales_per_tile = scales_vec.astype(jnp.float32)[owner]        # f32[num_tiles]

    out_slab = pl.pallas_call(
        _jitter_kernel,
        grid=(num_tiles,),
        in_specs=[
            pl.BlockSpec(memory_space=pltpu.MemorySpace.SMEM),      # seed  i32[1]
            pl.BlockSpec(memory_space=pltpu.MemorySpace.SMEM),      # scale f32[num_tiles]
            pl.BlockSpec((tile_r, _LANE), lambda i: (i, 0)),        # x slab (pipelined)
        ],
        out_specs=pl.BlockSpec((tile_r, _LANE), lambda i: (i, 0)),
        out_shape=jax.ShapeDtypeStruct((r_total, _LANE), io_dtype),
        compiler_params=pltpu.CompilerParams(
            dimension_semantics=("parallel",),
            vmem_limit_bytes=32 * 1024 * 1024,
        ),
    )(seed_arr, scales_per_tile, slab)

    # Unpack back to the original shapes / dtypes
    outs = []
    row_off = 0
    for t, sz, rp in zip(tensors, sizes, rows_pad):
        chunk = out_slab[row_off:row_off + rp].reshape(-1)[:sz]
        outs.append(chunk.reshape(t.shape).astype(t.dtype))
        row_off += rp
    return tuple(outs)


class RotationAugmenterPallas:
    """JAX/Pallas mirror of the reference RotationAugmenter.forward."""

    def __init__(self, locations, modalities, base_noise_stds, p=1.0, seed=0):
        self.locations = list(locations)
        self.modalities = list(modalities)
        self.base_noise_stds = dict(base_noise_stds)   # stand-in for init_value_range()
        # p = 1 corresponds to train_mode='predictive' + learn_framework='MTSS'
        self.p = float(p)
        self.seed = int(seed)
        self._rng = random.Random(seed)                # host-side `random() < p` decisions

    def __call__(self, org_loc_inputs, labels=None):
        pairs = [(loc, mod) for loc in self.locations for mod in self.modalities]
        tensors = tuple(org_loc_inputs[loc][mod] for loc, mod in pairs)
        b = tensors[0].shape[0]

        apply_flags = [1.0 if self._rng.random() < self.p else 0.0 for _ in pairs]
        scales = jnp.asarray(
            [flag * float(self.base_noise_stds[mod])
             for flag, (_, mod) in zip(apply_flags, pairs)],
            dtype=jnp.float32)
        seed_arr = jnp.asarray([self.seed], dtype=jnp.int32)

        outs = _jitter_tensors(tensors, scales, seed_arr)

        aug_loc_inputs = {loc: {} for loc in self.locations}
        for (loc, mod), out in zip(pairs, outs):
            aug_loc_inputs[loc][mod] = out

        labels_vec = jnp.asarray(apply_flags, dtype=jnp.float32)
        aug_mod_labels = jnp.tile(labels_vec[None, :], (b, 1)).astype(jnp.float32)
        # TODO(synk): the reference class also defines an (unused) numpy rotation_2d
        # helper that is never called in forward(); it is intentionally not ported.
        return aug_loc_inputs, aug_mod_labels, labels


if __name__ == "__main__":
    key = jax.random.PRNGKey(0)

    locations = ["shake"]
    modalities = ["audio", "acc"]
    base_noise_stds = {"audio": 0.1, "acc": 0.05}   # stand-in for init_value_range()

    b, c, i, s = 2, 4, 16, 16                       # x: [b, c, i, s]
    org_loc_inputs = {}
    for loc in locations:
        org_loc_inputs[loc] = {}
        for mod in modalities:
            key, sub = jax.random.split(key)
            org_loc_inputs[loc][mod] = jax.random.normal(sub, (b, c, i, s), dtype=jnp.float32)

    # p = 1: every (loc, mod) gets jittered (predictive + MTSS mode).
    augmenter = RotationAugmenterPallas(locations, modalities, base_noise_stds, p=1.0, seed=0)
    aug_inputs, aug_mod_labels, _ = augmenter(org_loc_inputs, labels=None)

    for loc in locations:
        for mod in modalities:
            out = jax.block_until_ready(aug_inputs[loc][mod])
            x = org_loc_inputs[loc][mod]
            assert out.shape == x.shape and out.dtype == x.dtype
            assert bool(jnp.all(jnp.isfinite(out)))
            noise_std = float(jnp.std(out - x))
            expect = base_noise_stds[mod]
            assert 0.7 * expect < noise_std < 1.3 * expect, (mod, noise_std, expect)
    jax.block_until_ready(aug_mod_labels)
    assert aug_mod_labels.shape == (b, len(locations) * len(modalities))
    assert bool(jnp.all(aug_mod_labels == 1.0))

    # p = 0: pure passthrough, labels all zero.
    augmenter0 = RotationAugmenterPallas(locations, modalities, base_noise_stds, p=0.0, seed=1)
    aug_inputs0, aug_mod_labels0, _ = augmenter0(org_loc_inputs, labels=None)
    for loc in locations:
        for mod in modalities:
            same = jax.block_until_ready(aug_inputs0[loc][mod])
            assert bool(jnp.array_equal(same, org_loc_inputs[loc][mod]))
    assert bool(jnp.all(jax.block_until_ready(aug_mod_labels0) == 0.0))

    print("KERNEL_OK")
</pallas_src>

<mosaic_0001>
module attributes {stable_mosaic.version = 11 : i64} {
  func.func @_jitter_kernel(%arg0: i32, %arg1: memref<1xi32, #tpu.memory_space<smem>>, %arg2: memref<2xf32, #tpu.memory_space<smem>>, %arg3: memref<8x512xf32, #tpu.memory_space<vmem>>, %arg4: memref<8x512xf32, #tpu.memory_space<vmem>>) attributes {dimension_semantics = [#tpu.dimension_semantics<parallel>], iteration_bounds = array<i64: 2>, scalar_prefetch = 0 : i64, scratch_operands = 0 : i64, tpu.core_type = #tpu.core_type<tc>, window_params = [{transform_indices = @transform_0, window_bounds = array<i64: 1>}, {transform_indices = @transform_1, window_bounds = array<i64: 2>}, {transform_indices = @transform_2, window_bounds = array<i64: 8, 512>}, {transform_indices = @transform_3, window_bounds = array<i64: 8, 512>}]} {
    %0 = tpu.iota {dimensions = array<i32: 0>} : vector<8x512xi32>
    %1 = tpu.iota {dimensions = array<i32: 1>} : vector<8x512xi32>
    %c8_i32 = arith.constant 8 : i32
    %2 = arith.muli %arg0, %c8_i32 : i32
    %3 = vector.broadcast %2 : i32 to vector<8x512xi32>
    %4 = arith.addi %3, %0 : vector<8x512xi32>
    %c512_i32 = arith.constant 512 : i32
    %5 = vector.broadcast %c512_i32 : i32 to vector<8x512xi32>
    %6 = arith.muli %4, %5 : vector<8x512xi32>
    %7 = arith.addi %6, %1 : vector<8x512xi32>
    %c0 = arith.constant 0 : index
    %8 = memref.load %arg1[%c0] : memref<1xi32, #tpu.memory_space<smem>>
    %c-1640531527_i32 = arith.constant -1640531527 : i32
    %9 = arith.muli %8, %c-1640531527_i32 : i32
    %10 = vector.broadcast %9 : i32 to vector<8x512xi32>
    %11 = arith.addi %7, %10 : vector<8x512xi32>
    %c16_i32 = arith.constant 16 : i32
    %12 = vector.broadcast %c16_i32 : i32 to vector<8x512xi32>
    %13 = arith.shrui %11, %12 : vector<8x512xi32>
    %14 = arith.xori %11, %13 : vector<8x512xi32>
    %c2146121005_i32 = arith.constant 2146121005 : i32
    %15 = vector.broadcast %c2146121005_i32 : i32 to vector<8x512xi32>
    %16 = arith.muli %14, %15 : vector<8x512xi32>
    %c15_i32 = arith.constant 15 : i32
    %17 = vector.broadcast %c15_i32 : i32 to vector<8x512xi32>
    %18 = arith.shrui %16, %17 : vector<8x512xi32>
    %19 = arith.xori %16, %18 : vector<8x512xi32>
    %c-2073254261_i32 = arith.constant -2073254261 : i32
    %20 = vector.broadcast %c-2073254261_i32 : i32 to vector<8x512xi32>
    %21 = arith.muli %19, %20 : vector<8x512xi32>
    %c16_i32_0 = arith.constant 16 : i32
    %22 = vector.broadcast %c16_i32_0 : i32 to vector<8x512xi32>
    %23 = arith.shrui %21, %22 : vector<8x512xi32>
    %24 = arith.xori %21, %23 : vector<8x512xi32>
    %c8_i32_1 = arith.constant 8 : i32
    %25 = vector.broadcast %c8_i32_1 : i32 to vector<8x512xi32>
    %26 = arith.shrui %24, %25 : vector<8x512xi32>
    %27 = arith.sitofp %26 : vector<8x512xi32> to vector<8x512xf32>
    %cst = arith.constant 5.000000e-01 : f32
    %28 = vector.broadcast %cst : f32 to vector<8x512xf32>
    %29 = arith.addf %27, %28 : vector<8x512xf32>
    %cst_2 = arith.constant 5.96046448E-8 : f32
    %30 = vector.broadcast %cst_2 : f32 to vector<8x512xf32>
    %31 = arith.mulf %29, %30 : vector<8x512xf32>
    %cst_3 = arith.constant 2.000000e+00 : f32
    %32 = vector.broadcast %cst_3 : f32 to vector<8x512xf32>
    %33 = arith.mulf %32, %31 : vector<8x512xf32>
    %cst_4 = arith.constant 1.000000e+00 : f32
    %34 = vector.broadcast %cst_4 : f32 to vector<8x512xf32>
    %35 = arith.subf %33, %34 : vector<8x512xf32>
    %cst_5 = arith.constant 1.000000e+00 : f32
    %36 = vector.broadcast %cst_5 : f32 to vector<8x512xf32>
    %37 = arith.subf %36, %35 : vector<8x512xf32>
    %cst_6 = arith.constant 1.000000e+00 : f32
    %38 = vector.broadcast %cst_6 : f32 to vector<8x512xf32>
    %39 = arith.addf %38, %35 : vector<8x512xf32>
    %40 = arith.mulf %37, %39 : vector<8x512xf32>
    %41 = math.log %40 : vector<8x512xf32>
    %cst_7 = arith.constant 0.000000e+00 : f32
    %42 = vector.broadcast %cst_7 : f32 to vector<8x512xf32>
    %43 = arith.subf %42, %41 : vector<8x512xf32>
    %cst_8 = arith.constant 2.500000e+00 : f32
    %44 = vector.broadcast %cst_8 : f32 to vector<8x512xf32>
    %45 = arith.subf %43, %44 : vector<8x512xf32>
    %cst_9 = arith.constant 2.81022636E-8 : f32
    %46 = vector.broadcast %cst_9 : f32 to vector<8x512xf32>
    %47 = arith.mulf %46, %45 : vector<8x512xf32>
    %cst_10 = arith.constant 3.43273939E-7 : f32
    %48 = vector.broadcast %cst_10 : f32 to vector<8x512xf32>
    %49 = arith.addf %47, %48 : vector<8x512xf32>
    %50 = arith.mulf %49, %45 : vector<8x512xf32>
    %cst_11 = arith.constant -3.5233877E-6 : f32
    %51 = vector.broadcast %cst_11 : f32 to vector<8x512xf32>
    %52 = arith.addf %50, %51 : vector<8x512xf32>
    %53 = arith.mulf %52, %45 : vector<8x512xf32>
    %cst_12 = arith.constant -4.39150654E-6 : f32
    %54 = vector.broadcast %cst_12 : f32 to vector<8x512xf32>
    %55 = arith.addf %53, %54 : vector<8x512xf32>
    %56 = arith.mulf %55, %45 : vector<8x512xf32>
    %cst_13 = arith.constant 2.1858087E-4 : f32
    %57 = vector.broadcast %cst_13 : f32 to vector<8x512xf32>
    %58 = arith.addf %56, %57 : vector<8x512xf32>
    %59 = arith.mulf %58, %45 : vector<8x512xf32>
    %cst_14 = arith.constant -0.00125372503 : f32
    %60 = vector.broadcast %cst_14 : f32 to vector<8x512xf32>
    %61 = arith.addf %59, %60 : vector<8x512xf32>
    %62 = arith.mulf %61, %45 : vector<8x512xf32>
    %cst_15 = arith.constant -0.00417768164 : f32
    %63 = vector.broadcast %cst_15 : f32 to vector<8x512xf32>
    %64 = arith.addf %62, %63 : vector<8x512xf32>
    %65 = arith.mulf %64, %45 : vector<8x512xf32>
    %cst_16 = arith.constant 0.246640727 : f32
    %66 = vector.broadcast %cst_16 : f32 to vector<8x512xf32>
    %67 = arith.addf %65, %66 : vector<8x512xf32>
    %68 = arith.mulf %67, %45 : vector<8x512xf32>
    %cst_17 = arith.constant 1.50140941 : f32
    %69 = vector.broadcast %cst_17 : f32 to vector<8x512xf32>
    %70 = arith.addf %68, %69 : vector<8x512xf32>
    %71 = math.sqrt %43 : vector<8x512xf32>
    %cst_18 = arith.constant 3.000000e+00 : f32
    %72 = vector.broadcast %cst_18 : f32 to vector<8x512xf32>
    %73 = arith.subf %71, %72 : vector<8x512xf32>
    %cst_19 = arith.constant -2.00214257E-4 : f32
    %74 = vector.broadcast %cst_19 : f32 to vector<8x512xf32>
    %75 = arith.mulf %74, %73 : vector<8x512xf32>
    %cst_20 = arith.constant 1.00950558E-4 : f32
    %76 = vector.broadcast %cst_20 : f32 to vector<8x512xf32>
    %77 = arith.addf %75, %76 : vector<8x512xf32>
    %78 = arith.mulf %77, %73 : vector<8x512xf32>
    %cst_21 = arith.constant 0.00134934322 : f32
    %79 = vector.broadcast %cst_21 : f32 to vector<8x512xf32>
    %80 = arith.addf %78, %79 : vector<8x512xf32>
    %81 = arith.mulf %80, %73 : vector<8x512xf32>
    %cst_22 = arith.constant -0.00367342844 : f32
    %82 = vector.broadcast %cst_22 : f32 to vector<8x512xf32>
    %83 = arith.addf %81, %82 : vector<8x512xf32>
    %84 = arith.mulf %83, %73 : vector<8x512xf32>
    %cst_23 = arith.constant 0.00573950773 : f32
    %85 = vector.broadcast %cst_23 : f32 to vector<8x512xf32>
    %86 = arith.addf %84, %85 : vector<8x512xf32>
    %87 = arith.mulf %86, %73 : vector<8x512xf32>
    %cst_24 = arith.constant -0.0076224613 : f32
    %88 = vector.broadcast %cst_24 : f32 to vector<8x512xf32>
    %89 = arith.addf %87, %88 : vector<8x512xf32>
    %90 = arith.mulf %89, %73 : vector<8x512xf32>
    %cst_25 = arith.constant 0.00943887047 : f32
    %91 = vector.broadcast %cst_25 : f32 to vector<8x512xf32>
    %92 = arith.addf %90, %91 : vector<8x512xf32>
    %93 = arith.mulf %92, %73 : vector<8x512xf32>
    %cst_26 = arith.constant 1.00167406 : f32
    %94 = vector.broadcast %cst_26 : f32 to vector<8x512xf32>
    %95 = arith.addf %93, %94 : vector<8x512xf32>
    %96 = arith.mulf %95, %73 : vector<8x512xf32>
    %cst_27 = arith.constant 2.83297682 : f32
    %97 = vector.broadcast %cst_27 : f32 to vector<8x512xf32>
    %98 = arith.addf %96, %97 : vector<8x512xf32>
    %cst_28 = arith.constant 5.000000e+00 : f32
    %99 = vector.broadcast %cst_28 : f32 to vector<8x512xf32>
    %100 = arith.cmpf olt, %43, %99 : vector<8x512xf32>
    %101 = arith.select %100, %70, %98 : vector<8x512xi1>, vector<8x512xf32>
    %102 = arith.mulf %101, %35 : vector<8x512xf32>
    %cst_29 = arith.constant 1.41421354 : f32
    %103 = vector.broadcast %cst_29 : f32 to vector<8x512xf32>
    %104 = arith.mulf %103, %102 : vector<8x512xf32>
    %105 = arith.index_cast %arg0 : i32 to index
    %106 = memref.load %arg2[%105] : memref<2xf32, #tpu.memory_space<smem>>
    %c0_30 = arith.constant 0 : index
    %c0_31 = arith.constant 0 : index
    %107 = vector.load %arg3[%c0_30, %c0_31] : memref<8x512xf32, #tpu.memory_space<vmem>>, vector<8x512xf32>
    %108 = vector.broadcast %106 : f32 to vector<8x512xf32>
    %109 = arith.mulf %104, %108 : vector<8x512xf32>
    %110 = arith.addf %107, %109 : vector<8x512xf32>
    %c0_32 = arith.constant 0 : index
    %c0_33 = arith.constant 0 : index
    %111 = vector.load %arg4[%c0_32, %c0_33] : memref<8x512xf32, #tpu.memory_space<vmem>>, vector<8x512xf32>
    tpu.vector_store %arg4[%c0_32, %c0_33], %110 {strides = array<i32>} : memref<8x512xf32, #tpu.memory_space<vmem>>, vector<8x512xf32>,
    return
  }
  func.func @transform_0(%arg0: i32) -> i32 {
    %c0_i32 = arith.constant 0 : i32
    %c0_i32_0 = arith.constant 0 : i32
    return %c0_i32 : i32
  }
  func.func @transform_1(%arg0: i32) -> i32 {
    %c0_i32 = arith.constant 0 : i32
    %c0_i32_0 = arith.constant 0 : i32
    return %c0_i32 : i32
  }
  func.func @transform_2(%arg0: i32) -> (i32, i32) {
    %c0_i32 = arith.constant 0 : i32
    %c0_i32_0 = arith.constant 0 : i32
    return %arg0, %c0_i32 : i32, i32
  }
  func.func @transform_3(%arg0: i32) -> (i32, i32) {
    %c0_i32 = arith.constant 0 : i32
    %c0_i32_0 = arith.constant 0 : i32
    return %arg0, %c0_i32 : i32, i32
  }
}

</mosaic_0001>

<bundles_post_ra>
// kernel: _jitter_tensors.1
= control target key start
LH: loop header
LB: loop body
LE: loop exit
PB: predicated region body
PF: predicated region fallthrough
CT: control target
= control target key end

     0   :  { %s873_s0 = inlined_call_operand.<no memory space> [shape: s32[1], index: 0, kind: input, shape index: {}]   ;;  %s874_s1 = inlined_call_operand.vmem [shape: f32[2], index: 1, kind: input, shape index: {}]   ;;  %s875_s2 = inlined_call_operand.vmem [shape: f32[16,512], index: 2, kind: input, shape index: {}]   ;;  %s876_s3 = inlined_call_operand.vmem [shape: f32[16,512], index: 3, kind: output, shape index: {}]  }
   0x1   :  { %8 = sst [smem:[#allocation2]] %s873_s0 }
   0x2   :  { %9 = vsyncpa [#allocation4], 0  ;;  %s687_s14 = smov 0  }
   0x3 LB: > { %s693_s15 = sadd.s32 4294967295, %s661_s14   ;;  %p575_p0 = scmp.ge.s32.totalorder %s661_s14, 1  ;;  %s661_s14 = sphi %s687_s14, %s15_s14  }
   0x4   : > { %p114_p1 = scmp.lt.s32.totalorder %s661_s14, 3  ;;  %s129_s0 = sshll.u32 %s874_s1, 4  ;;  %s130_s0 = int_to_ptr.vmem [resolvable:$true] %s129_s0 }
   0x5   : > { %p609_p3 = scmp.eq.s32.totalorder %s693_s15, 0  ;;  %s663_s18 = smov [#allocation3]  }
   0x6   : > { %p115_p2 = pnand %p575_p0, %p114_p1 }
   0x8   : > { %p605_p4 = pneg %p115_p2  ;;  %150 = sbr.rel (%p115_p2) target bundleno = 139 (0x8b), region = 32 }
   0xa   : > { %p606_p5 = pnand %p609_p3, %p605_p4 }
   0xc   : > { %608 = dma.vmem_to_smem (!%p606_p5), %s130_s0, 16, %s663_s18, [#allocation4]  }
   0xd   : > { %656 = dma.done.wait (%p609_p3), [#allocation4], 16  }
   0xe   : > { %658 = vsyncadd (%p609_p3), [#allocation4], 4294967280 }
   0xf   : > { %157 = sfence }
  0x10   : > { %v186_v0 = vlaneseq  ;;  %s584_s19 = sshll.u32 %s693_s15, 3  ;;  %s201_s20 = sld [smem:[#allocation2]] }
  0x11   : > { %v194_v1 = vstv %s584_s19  ;;  %p176_p6 = scmp.lt.s32.totalorder %s693_s15, 1  ;;  %s488_s23 = sld [smem:[#allocation3 + %s693_s15]] }
  0x12   : > { %v187_v2 = vshrl.u32 %v186_v0, 7  ;;  %v189_v3 = vand.u32 127, %v186_v0 }
  0x13   : > { %s839_s22 = scalar_select %p176_p6, %s693_s15, 1 }
  0x14   : > { %v190_v4 = vadd.s32 128, %v189_v3  ;;  %v191_v5 = vadd.s32 256, %v189_v3  ;;  %v192_v6 = vadd.s32 384, %v189_v3  ;;  %v195_v7 = vadd.s32 %v194_v1, %v187_v2 }
  0x15   : > { %s599_s24 = sshll.u32 %s839_s22, 5 }
  0x16   : > { %v196_v8 = vmul.u32 512, %v195_v7  ;;  %s202_s21 = smul.u32 2654435769, %s201_s20  ;;  %s180_s27 = scalar_lea.vmem %s875_s2, %s599_s24 }
  0x17   : > { %s185_s30 = scalar_lea.vmem %s876_s3, %s599_s24 }
  0x18   : > { %v197_v9 = vadd.s32 %v196_v8, %v189_v3  ;;  %v198_v10 = vadd.s32 %v196_v8, %v190_v4  ;;  %v199_v11 = vadd.s32 %v196_v8, %v191_v5  ;;  %v200_v12 = vadd.s32 %v196_v8, %v192_v6 }
  0x19   : > { %v203_v13 = vstv %s202_s21 }
  0x1a   : > { %v204_v14 = vadd.s32 %v203_v13, %v197_v9  ;;  %v205_v15 = vadd.s32 %v203_v13, %v198_v10  ;;  %v206_v16 = vadd.s32 %v203_v13, %v199_v11  ;;  %v207_v17 = vadd.s32 %v203_v13, %v200_v12 }
  0x1c   : > { %v208_v18 = vshrl.u32 %v204_v14, 16  ;;  %v209_v19 = vshrl.u32 %v205_v15, 16  ;;  %v210_v20 = vshrl.u32 %v206_v16, 16  ;;  %v211_v21 = vshrl.u32 %v207_v17, 16 }
  0x1e   : > { %v212_v22 = vxor.u32 %v208_v18, %v204_v14  ;;  %v213_v23 = vxor.u32 %v209_v19, %v205_v15  ;;  %v214_v24 = vxor.u32 %v210_v20, %v206_v16  ;;  %v215_v25 = vxor.u32 %v211_v21, %v207_v17 }
  0x20   : > { %v216_v26 = vmul.u32 2146121005, %v212_v22  ;;  %v217_v27 = vmul.u32 2146121005, %v213_v23  ;;  %v218_v28 = vmul.u32 2146121005, %v214_v24 }
  0x21   : > { %v219_v29 = vmul.u32 2146121005, %v215_v25 }
  0x22   : > { %v220_v30 = vshrl.u32 %v216_v26, 15  ;;  %v221_v31 = vshrl.u32 %v217_v27, 15  ;;  %v222_v32 = vshrl.u32 %v218_v28, 15 }
  0x23   : > { %v223_v33 = vshrl.u32 %v219_v29, 15 }
  0x24   : > { %v224_v34 = vxor.u32 %v220_v30, %v216_v26  ;;  %v225_v35 = vxor.u32 %v221_v31, %v217_v27  ;;  %v226_v36 = vxor.u32 %v222_v32, %v218_v28 }
  0x25   : > { %v227_v37 = vxor.u32 %v223_v33, %v219_v29 }
  0x26   : > { %v228_v38 = vmul.u32 2221713035, %v224_v34  ;;  %v229_v39 = vmul.u32 2221713035, %v225_v35  ;;  %v230_v40 = vmul.u32 2221713035, %v226_v36 }
  0x27   : > { %v231_v41 = vmul.u32 2221713035, %v227_v37 }
  0x28   : > { %v232_v42 = vshrl.u32 %v228_v38, 16  ;;  %v233_v43 = vshrl.u32 %v229_v39, 16  ;;  %v234_v44 = vshrl.u32 %v230_v40, 16 }
  0x29   : > { %v235_v45 = vshrl.u32 %v231_v41, 16 }
  0x2a   : > { %v236_v46 = vxor.u32 %v232_v42, %v228_v38  ;;  %v237_v47 = vxor.u32 %v233_v43, %v229_v39  ;;  %v238_v48 = vxor.u32 %v234_v44, %v230_v40 }
  0x2b   : > { %v239_v49 = vxor.u32 %v235_v45, %v231_v41 }
  0x2c   : > { %v240_v50 = vshrl.u32 %v236_v46, 8  ;;  %v241_v51 = vshrl.u32 %v237_v47, 8  ;;  %v242_v52 = vshrl.u32 %v238_v48, 8 }
  0x2d   : > { %v243_v53 = vshrl.u32 %v239_v49, 8 }
  0x2e   : > { %v244_v54 = vcvt.s32.f32 %v240_v50  ;;  %v245_v55 = vcvt.s32.f32 %v241_v51  ;;  %v246_v56 = vcvt.s32.f32 %v242_v52 }
  0x2f   : > { %v247_v57 = vcvt.s32.f32 %v243_v53 }
  0x30   : > { %v248_v58 = vadd.f32 0.5, %v244_v54  ;;  %v249_v59 = vadd.f32 0.5, %v245_v55  ;;  %v250_v60 = vadd.f32 0.5, %v246_v56 }
  0x31   : > { %v251_v61 = vadd.f32 0.5, %v247_v57 }
  0x32   : > { %v252_v62 = vmul.f32 5.9604645e-08, %v248_v58  ;;  %v253_v63 = vmul.f32 5.9604645e-08, %v249_v59  ;;  %v254_v0 = vmul.f32 5.9604645e-08, %v250_v60 }
  0x33   : > { %v255_v1 = vmul.f32 5.9604645e-08, %v251_v61 }
  0x34   : > { %v256_v2 = vmul.f32 2.0, %v252_v62  ;;  %v257_v3 = vmul.f32 2.0, %v253_v63  ;;  %v258_v4 = vmul.f32 2.0, %v254_v0 }
  0x35   : > { %v259_v5 = vmul.f32 2.0, %v255_v1 }
  0x36   : > { %v702_v6 = vadd.f32 -1.0, %v256_v2  ;;  %v704_v7 = vadd.f32 -1.0, %v257_v3  ;;  %v706_v8 = vadd.f32 -1.0, %v258_v4 }
  0x37   : > { %v708_v9 = vadd.f32 -1.0, %v259_v5 }
  0x38   : > { %v264_v10 = vsub.f32 1.0, %v702_v6  ;;  %v265_v11 = vsub.f32 1.0, %v704_v7  ;;  %v266_v12 = vsub.f32 1.0, %v706_v8  ;;  %v268_v13 = vadd.f32 1.0, %v702_v6 }
  0x39   : > { %v267_v14 = vsub.f32 1.0, %v708_v9  ;;  %v269_v15 = vadd.f32 1.0, %v704_v7  ;;  %v270_v16 = vadd.f32 1.0, %v706_v8  ;;  %v271_v17 = vadd.f32 1.0, %v708_v9 }
  0x3a   : > { %v272_v18 = vmul.f32 %v268_v13, %v264_v10 }
  0x3b   : > { %v273_v19 = vmul.f32 %v269_v15, %v265_v11  ;;  %v274_v20 = vmul.f32 %v270_v16, %v266_v12  ;;  %v275_v21 = vmul.f32 %v271_v17, %v267_v14 }
  0x3c   : > { %620 = vlog2.f32 %v272_v18 }
  0x3d   : > { %622 = vlog2.f32 %v273_v19 }
  0x3e   : > { %624 = vlog2.f32 %v274_v20 }
  0x3f   : > { %626 = vlog2.f32 %v275_v21 }
  0x42   : > { %v621_v22 = vpop.eup %620 }
  0x43   : > { %v623_v23 = vpop.eup %622  ;;  %v277_v24 = vmul.f32 0.6931472, %v621_v22 }
  0x44   : > { %v625_v25 = vpop.eup %624  ;;  %v279_v26 = vmul.f32 0.6931472, %v623_v23 }
  0x45   : > { %v627_v27 = vpop.eup %626  ;;  %v281_v28 = vmul.f32 0.6931472, %v625_v25  ;;  %v718_v29 = vsub.f32 0.0, %v277_v24 }
  0x46   : > { %v283_v30 = vmul.f32 0.6931472, %v627_v27  ;;  %v720_v31 = vsub.f32 0.0, %v279_v26 }
  0x47   : > { %v722_v32 = vsub.f32 0.0, %v281_v28  ;;  %v725_v33 = vadd.f32 -2.5, %v718_v29  ;;  %628 = vrsqrt.f32 %v718_v29  ;;  %vm363_vm0 = vcmp.eq.f32.partialorder %v718_v29, inf }
  0x48   : > { %v728_v34 = vsub.f32 0.0, %v283_v30  ;;  %v731_v35 = vadd.f32 -2.5, %v720_v31  ;;  %630 = vrsqrt.f32 %v720_v31  ;;  %vm365_vm1 = vcmp.eq.f32.partialorder %v718_v29, 0.0 }
  0x49   : > { %v734_v36 = vadd.f32 -2.5, %v722_v32  ;;  %v292_v37 = vmul.f32 2.8102264e-08, %v725_v33  ;;  %632 = vrsqrt.f32 %v722_v32  ;;  %v366_v17 = vand.u32 2147483648, %v718_v29 }
  0x4a   : > { %v739_v38 = vadd.f32 -2.5, %v728_v34  ;;  %v293_v39 = vmul.f32 2.8102264e-08, %v731_v35  ;;  %634 = vrsqrt.f32 %v728_v34  ;;  %vm375_vm2 = vcmp.eq.f32.partialorder %v720_v31, inf }
  0x4b   : > { %v294_v40 = vmul.f32 2.8102264e-08, %v734_v36  ;;  %v296_v41 = vadd.f32 3.4327394e-07, %v292_v37  ;;  %vm377_vm3 = vcmp.eq.f32.partialorder %v720_v31, 0.0  ;;  %v378_v23 = vand.u32 2147483648, %v720_v31 }
  0x4c   : > { %v295_v42 = vmul.f32 2.8102264e-08, %v739_v38  ;;  %v297_v43 = vadd.f32 3.4327394e-07, %v293_v39  ;;  %vm387_vm4 = vcmp.eq.f32.partialorder %v722_v32, inf  ;;  %vm389_vm5 = vcmp.eq.f32.partialorder %v722_v32, 0.0 }
  0x4d   : > { %v629_v44 = vpop.eup %628  ;;  %v298_v45 = vadd.f32 3.4327394e-07, %v294_v40  ;;  %v300_v46 = vmul.f32 %v725_v33, %v296_v41  ;;  %vm399_vm6 = vcmp.eq.f32.partialorder %v728_v34, inf  ;;  %vm401_vm7 = vcmp.eq.f32.partialorder %v728_v34, 0.0 }
  0x4e   : > { %v299_v47 = vadd.f32 3.4327394e-07, %v295_v42  ;;  %v301_v48 = vmul.f32 %v731_v35, %v297_v43  ;;  %v357_v49 = vmul.f32 %v629_v44, %v718_v29  ;;  %v631_v50 = vpop.eup %630  ;;  %v390_v42 = vand.u32 2147483648, %v722_v32 }
  0x4f   : > { %v302_v51 = vmul.f32 %v734_v36, %v298_v45  ;;  %v304_v52 = vadd.f32 -3.5233877e-06, %v300_v46  ;;  %v369_v56 = vmul.f32 %v631_v50, %v720_v31  ;;  %v633_v57 = vpop.eup %632  ;;  %vm472_vm8 = vcmp.lt.f32.partialorder %v718_v29, 5.0 }
  0x50   : > { %v303_v53 = vmul.f32 %v739_v38, %v299_v47  ;;  %v305_v54 = vadd.f32 -3.5233877e-06, %v301_v48  ;;  %v358_v55 = vmul.f32 %v629_v44, %v357_v49  ;;  %v635_v0 = vpop.eup %634  ;;  %v381_v2 = vmul.f32 %v633_v57, %v722_v32 }
  0x51   : > { %v306_v58 = vadd.f32 -3.5233877e-06, %v302_v51  ;;  %v308_v59 = vmul.f32 %v725_v33, %v304_v52  ;;  %v370_v63 = vmul.f32 %v631_v50, %v369_v56  ;;  %v393_v11 = vmul.f32 %v635_v0, %v728_v34 }
  0x52   : > { %v307_v60 = vadd.f32 -3.5233877e-06, %v303_v53  ;;  %v309_v61 = vmul.f32 %v731_v35, %v305_v54  ;;  %v359_v62 = vmul.f32 0.5, %v358_v55  ;;  %v382_v10 = vmul.f32 %v633_v57, %v381_v2 }
  0x53   : > { %v310_v1 = vmul.f32 %v734_v36, %v306_v58  ;;  %v371_v4 = vmul.f32 0.5, %v370_v63  ;;  %v312_v5 = vadd.f32 -4.3915065e-06, %v308_v59  ;;  %v394_v19 = vmul.f32 %v635_v0, %v393_v11 }
  0x54   : > { %v360_v3 = vsub.f32 1.5, %v359_v62  ;;  %v311_v12 = vmul.f32 %v739_v38, %v307_v60  ;;  %v313_v13 = vadd.f32 -4.3915065e-06, %v309_v61  ;;  %v383_v18 = vmul.f32 0.5, %v382_v10 }
  0x55   : > { %v372_v15 = vsub.f32 1.5, %v371_v4  ;;  %v314_v16 = vadd.f32 -4.3915065e-06, %v310_v1  ;;  %v316_v22 = vmul.f32 %v725_v33, %v312_v5  ;;  %v395_v25 = vmul.f32 0.5, %v394_v19 }
  0x56   : > { %v361_v14 = vmul.f32 %v629_v44, %v360_v3  ;;  %v384_v24 = vsub.f32 1.5, %v383_v18  ;;  %v315_v26 = vadd.f32 -4.3915065e-06, %v311_v12  ;;  %v317_v27 = vmul.f32 %v731_v35, %v313_v13 }
  0x57   : > { %v373_v21 = vmul.f32 %v631_v50, %v372_v15  ;;  %v318_v37 = vmul.f32 %v734_v36, %v314_v16  ;;  %v396_v43 = vsub.f32 1.5, %v395_v25  ;;  %v320_v44 = vadd.f32 0.00021858087, %v316_v22 }
  0x58   : > { %v362_v20 = vmul.f32 %v361_v14, %v718_v29  ;;  %v385_v40 = vmul.f32 %v633_v57, %v384_v24  ;;  %v319_v47 = vmul.f32 %v739_v38, %v315_v26  ;;  %v321_v48 = vadd.f32 0.00021858087, %v317_v27 }
  0x59   : > { %v374_v30 = vmul.f32 %v373_v21, %v720_v31  ;;  %v397_v49 = vmul.f32 %v635_v0, %v396_v43  ;;  %v322_v51 = vadd.f32 0.00021858087, %v318_v37  ;;  %v402_v53 = vand.u32 2147483648, %v728_v34 }
  0x5a   : > { %v364_v28 = vsel %vm363_vm0, %v718_v29, %v362_v20  ;;  %v386_v46 = vmul.f32 %v385_v40, %v722_v32  ;;  %v324_v57 = vmul.f32 %v725_v33, %v320_v44  ;;  %v323_v60 = vadd.f32 0.00021858087, %v319_v47 }
  0x5b   : > { %v367_v39 = vsel %vm365_vm1, %v366_v17, %v364_v28  ;;  %v376_v41 = vsel %vm375_vm2, %v720_v31, %v374_v30  ;;  %v398_v56 = vmul.f32 %v397_v49, %v728_v34  ;;  %v325_v61 = vmul.f32 %v731_v35, %v321_v48 }
  0x5c   : > { %v379_v45 = vsel %vm377_vm3, %v378_v23, %v376_v41  ;;  %v783_v50 = vadd.f32 -3.0, %v367_v39  ;;  %v388_v52 = vsel %vm387_vm4, %v722_v32, %v386_v46  ;;  %v326_v0 = vmul.f32 %v734_v36, %v322_v51 }
  0x5d   : > { %v787_v54 = vadd.f32 -3.0, %v379_v45  ;;  %v391_v55 = vsel %vm389_vm5, %v390_v42, %v388_v52  ;;  %v400_v62 = vsel %vm399_vm6, %v728_v34, %v398_v56  ;;  %v328_v5 = vadd.f32 -0.001253725, %v324_v57 }
  0x5e   : > { %v792_v58 = vadd.f32 -3.0, %v391_v55  ;;  %v408_v59 = vmul.f32 -0.00020021426, %v783_v50  ;;  %v403_v1 = vsel %vm401_vm7, %v402_v53, %v400_v62  ;;  %v327_v12 = vmul.f32 %v739_v38, %v323_v60 }
  0x5f   : > { %v409_v63 = vmul.f32 -0.00020021426, %v787_v54  ;;  %v802_v3 = vadd.f32 -3.0, %v403_v1  ;;  %v329_v13 = vadd.f32 -0.001253725, %v325_v61  ;;  %v332_v21 = vmul.f32 %v725_v33, %v328_v5 }
  0x60   : > { %v410_v2 = vmul.f32 -0.00020021426, %v792_v58  ;;  %v412_v4 = vadd.f32 0.00010095056, %v408_v59  ;;  %v330_v16 = vadd.f32 -0.001253725, %v326_v0 }
  0x61   : > { %v413_v10 = vadd.f32 0.00010095056, %v409_v63  ;;  %v411_v14 = vmul.f32 -0.00020021426, %v802_v3  ;;  %v331_v24 = vadd.f32 -0.001253725, %v327_v12  ;;  %v333_v25 = vmul.f32 %v731_v35, %v329_v13 }
  0x62   : > { %v414_v11 = vadd.f32 0.00010095056, %v410_v2  ;;  %v416_v15 = vmul.f32 %v783_v50, %v412_v4  ;;  %v334_v28 = vmul.f32 %v734_v36, %v330_v16  ;;  %v336_v41 = vadd.f32 -0.0041776816, %v332_v21 }
  0x63   : > { %v417_v17 = vmul.f32 %v787_v54, %v413_v10  ;;  %v415_v19 = vadd.f32 0.00010095056, %v411_v14  ;;  %v335_v44 = vmul.f32 %v739_v38, %v331_v24  ;;  %v337_v45 = vadd.f32 -0.0041776816, %v333_v25 }
  0x64   : > { %v418_v18 = vmul.f32 %v792_v58, %v414_v11  ;;  %v420_v20 = vadd.f32 0.0013493432, %v416_v15  ;;  %v338_v48 = vadd.f32 -0.0041776816, %v334_v28  ;;  %v340_v55 = vmul.f32 %v725_v33, %v336_v41 }
  0x65   : > { %v421_v22 = vadd.f32 0.0013493432, %v417_v17  ;;  %v419_v26 = vmul.f32 %v802_v3, %v415_v19  ;;  %v339_v59 = vadd.f32 -0.0041776816, %v335_v44  ;;  %v341_v60 = vmul.f32 %v731_v35, %v337_v45 }
  0x66   : > { %v422_v23 = vadd.f32 0.0013493432, %v418_v18  ;;  %v424_v27 = vmul.f32 %v783_v50, %v420_v20  ;;  %v342_v63 = vmul.f32 %v734_v36, %v338_v48  ;;  %v344_v5 = vadd.f32 0.24664073, %v340_v55 }
  0x67   : > { %v425_v30 = vmul.f32 %v787_v54, %v421_v22  ;;  %v423_v39 = vadd.f32 0.0013493432, %v419_v26  ;;  %v343_v12 = vmul.f32 %v739_v38, %v339_v59  ;;  %v345_v13 = vadd.f32 0.24664073, %v341_v60 }
  0x68   : > { %v426_v37 = vmul.f32 %v792_v58, %v422_v23  ;;  %v428_v40 = vadd.f32 -0.0036734284, %v424_v27  ;;  %v346_v16 = vadd.f32 0.24664073, %v342_v63  ;;  %v348_v21 = vmul.f32 %v725_v33, %v344_v5  ;;  %v490_v63 = vld [vmem:[%s180_s27 + $0x8] sm:$0xff] }
  0x69   : > { %v429_v42 = vadd.f32 -0.0036734284, %v425_v30  ;;  %v427_v46 = vmul.f32 %v802_v3, %v423_v39  ;;  %v347_v24 = vadd.f32 0.24664073, %v343_v12  ;;  %v349_v25 = vmul.f32 %v731_v35, %v345_v13 }
  0x6a   : > { %v430_v43 = vadd.f32 -0.0036734284, %v426_v37  ;;  %v432_v47 = vmul.f32 %v783_v50, %v428_v40  ;;  %v350_v28 = vmul.f32 %v734_v36, %v346_v16  ;;  %v352_v40 = vadd.f32 1.5014094, %v348_v21 }
  0x6b   : > { %v433_v49 = vmul.f32 %v787_v54, %v429_v42  ;;  %v431_v52 = vadd.f32 -0.0036734284, %v427_v46  ;;  %v351_v35 = vmul.f32 %v739_v38, %v347_v24  ;;  %vm473_vm9 = vcmp.lt.f32.partialorder %v720_v31, 5.0 }
  0x6c   : > { %v434_v51 = vmul.f32 %v792_v58, %v430_v43  ;;  %v436_v53 = vadd.f32 0.0057395077, %v432_v47  ;;  %v353_v43 = vadd.f32 1.5014094, %v349_v25  ;;  %v354_v36 = vadd.f32 1.5014094, %v350_v28 }
  0x6d   : > { %v437_v56 = vadd.f32 0.0057395077, %v433_v49  ;;  %v435_v61 = vmul.f32 %v802_v3, %v431_v52  ;;  %vm474_vm10 = vcmp.lt.f32.partialorder %v722_v32, 5.0  ;;  %v355_v52 = vadd.f32 1.5014094, %v351_v35 }
  0x6e   : > { %v438_v57 = vadd.f32 0.0057395077, %v434_v51  ;;  %v440_v62 = vmul.f32 %v783_v50, %v436_v53  ;;  %vm475_vm11 = vcmp.lt.f32.partialorder %v728_v34, 5.0  ;;  %v491_v34 = vld [vmem:[%s180_s27 + $0x10] sm:$0xff] }
  0x6f   : > { %v441_v0 = vmul.f32 %v787_v54, %v437_v56  ;;  %v439_v2 = vadd.f32 0.0057395077, %v435_v61  ;;  %v493_v56 = vstv %s488_s23  ;;  %v489_v61 = vld [vmem:[%s180_s27] sm:$0xff] }
  0x70   : > { %v442_v1 = vmul.f32 %v792_v58, %v438_v57  ;;  %v444_v4 = vadd.f32 -0.0076224613, %v440_v62 }
  0x71   : > { %v445_v10 = vadd.f32 -0.0076224613, %v441_v0  ;;  %v443_v14 = vmul.f32 %v802_v3, %v439_v2  ;;  %v492_v2 = vld [vmem:[%s180_s27 + $0x18] sm:$0xff] }
  0x72   : > { %v446_v11 = vadd.f32 -0.0076224613, %v442_v1  ;;  %v448_v15 = vmul.f32 %v783_v50, %v444_v4 }
  0x73   : > { %v449_v17 = vmul.f32 %v787_v54, %v445_v10  ;;  %v447_v19 = vadd.f32 -0.0076224613, %v443_v14 }
  0x74   : > { %v450_v18 = vmul.f32 %v792_v58, %v446_v11  ;;  %v452_v20 = vadd.f32 0.0094388705, %v448_v15 }
  0x75   : > { %v453_v22 = vadd.f32 0.0094388705, %v449_v17  ;;  %v451_v26 = vmul.f32 %v802_v3, %v447_v19 }
  0x76   : > { %v454_v23 = vadd.f32 0.0094388705, %v450_v18  ;;  %v456_v27 = vmul.f32 %v783_v50, %v452_v20 }
  0x77   : > { %v457_v30 = vmul.f32 %v787_v54, %v453_v22  ;;  %v455_v39 = vadd.f32 0.0094388705, %v451_v26 }
  0x78   : > { %v458_v37 = vmul.f32 %v792_v58, %v454_v23  ;;  %v460_v33 = vadd.f32 1.001674, %v456_v27 }
  0x79   : > { %v461_v41 = vadd.f32 1.001674, %v457_v30  ;;  %v459_v44 = vmul.f32 %v802_v3, %v455_v39 }
  0x7a   : > { %v462_v42 = vadd.f32 1.001674, %v458_v37  ;;  %v464_v45 = vmul.f32 %v783_v50, %v460_v33 }
  0x7b   : > { %v465_v46 = vmul.f32 %v787_v54, %v461_v41  ;;  %v463_v48 = vadd.f32 1.001674, %v459_v44 }
  0x7c   : > { %v466_v47 = vmul.f32 %v792_v58, %v462_v42  ;;  %v468_v49 = vadd.f32 2.8329768, %v464_v45 }
  0x7d   : > { %v469_v38 = vadd.f32 2.8329768, %v465_v46  ;;  %v467_v53 = vmul.f32 %v802_v3, %v463_v48 }
  0x7e   : > { %v470_v51 = vadd.f32 2.8329768, %v466_v47  ;;  %v476_v50 = vsel %vm472_vm8, %v352_v40, %v468_v49 }
  0x7f   : > { %v477_v29 = vsel %vm473_vm9, %v353_v43, %v469_v38  ;;  %v480_v31 = vmul.f32 %v702_v6, %v476_v50  ;;  %v471_v58 = vadd.f32 2.8329768, %v467_v53 }
  0x80   : > { %v478_v54 = vsel %vm474_vm10, %v354_v36, %v470_v51  ;;  %v481_v32 = vmul.f32 %v704_v7, %v477_v29 }
  0x81   : > { %v482_v55 = vmul.f32 %v706_v8, %v478_v54  ;;  %v484_v3 = vmul.f32 1.4142135, %v480_v31  ;;  %v479_v57 = vsel %vm475_vm11, %v355_v52, %v471_v58 }
  0x82   : > { %v485_v59 = vmul.f32 1.4142135, %v481_v32  ;;  %v483_v62 = vmul.f32 %v708_v9, %v479_v57 }
  0x83   : > { %v486_v60 = vmul.f32 1.4142135, %v482_v55  ;;  %v494_v0 = vmul.f32 %v493_v56, %v484_v3 }
  0x84   : > { %v495_v6 = vmul.f32 %v493_v56, %v485_v59  ;;  %v487_v1 = vmul.f32 1.4142135, %v483_v62 }
  0x85   : > { %v496_v7 = vmul.f32 %v493_v56, %v486_v60  ;;  %v498_v8 = vadd.f32 %v494_v0, %v489_v61 }
  0x86   : > { %v499_v4 = vadd.f32 %v495_v6, %v490_v63  ;;  %v497_v10 = vmul.f32 %v493_v56, %v487_v1 }
  0x87   : > { %v500_v5 = vadd.f32 %v496_v7, %v491_v34  ;;  %502 = vst [vmem:[%s185_s30] sm:$0xff] %v498_v8 }
  0x88   : > { %503 = vst [vmem:[%s185_s30 + $0x8] sm:$0xff] %v499_v4  ;;  %v501_v11 = vadd.f32 %v497_v10, %v492_v2 }
  0x89   : > { %504 = vst [vmem:[%s185_s30 + $0x10] sm:$0xff] %v500_v5 }
  0x8a   : > { %505 = vst [vmem:[%s185_s30 + $0x18] sm:$0xff] %v501_v11 }
  0x8b PF: > { %s15_s14 = sadd.s32 1, %s661_s14  }
  0x8c   : > { %p12_p7 = scmp.ge.s32.totalorder %s15_s14, 4  }
  0x8e   :  { %14 = sbr.rel (!%p12_p7) target bundleno = 3 (0x3), region = 67 }
  0x93   :  { %527 = vsyncpa [#allocation4], 1 }
  0x94   :  { %529 = vsyncpa [#allocation4 + $0x1], 1 }

</bundles_post_ra>
